<compile_context>
chip_gen: v5e
topology: v5e:2x2
jax: 0.10.0
libtpu: 0.0.40
codegen_flags: <defaults>
</compile_context>

<pallas_src>
import numpy as np
import jax
import jax.numpy as jnp
from jax.experimental import pallas as pl
from jax.experimental.pallas import tpu as pltpu

WINDOW_SIZE = 11
SIGMA = 1.5
C1 = 0.01 ** 2
C2 = 0.03 ** 2


def _gaussian_1d(window_size, sigma):
    xs = np.arange(window_size, dtype=np.float64) - window_size // 2
    g = np.exp(-(xs ** 2) / (2.0 * sigma ** 2))
    return (g / g.sum()).astype(np.float32)


def _conv_matrix(size, window_size=WINDOW_SIZE, sigma=SIGMA):
    # A[out, in] = g[in - out + pad]  (matches F.conv2d with zero padding=ws//2)
    g = _gaussian_1d(window_size, sigma)
    pad = window_size // 2
    A = np.zeros((size, size), np.float32)
    for o in range(size):
        for k in range(window_size):
            i = o + k - pad
            if 0 <= i < size:
                A[o, i] = g[k]
    return A


def _make_ssim_kernel(rows, wd):
    """Kernel over one (rows, wd) tile per grid step.

    rows = TB*C*H (row index = (b, c, h), h fastest)
    wd   = W*D    (lane index = (w, d), d fastest)
    """
    aligned = (rows % 8 == 0) and (wd % 128 == 0)

    def kernel(p_ref, t_ref, l_ref, r_ref, out_ref):
        p = p_ref[...]          # (rows, wd) f32, lane-dense
        t = t_ref[...]
        lmat = l_ref[...]       # (rows, rows) = I_{TB*C} (x) Ah
        rmat = r_ref[...]       # (wd, wd)     = Aw^T (x) I_D

        def gconv(x):
            # depthwise separable Gaussian blur as two MXU matmuls
            y = jnp.dot(lmat, x, preferred_element_type=jnp.float32)      # H pass
            return jnp.dot(y, rmat, preferred_element_type=jnp.float32)   # W pass

        mu1 = gconv(p)
        mu2 = gconv(t)
        mu1_sq = mu1 * mu1
        mu2_sq = mu2 * mu2
        mu1_mu2 = mu1 * mu2
        sigma1_sq = gconv(p * p) - mu1_sq
        sigma2_sq = gconv(t * t) - mu2_sq
        sigma12 = gconv(p * t) - mu1_mu2

        num = (2.0 * mu1_mu2 + C1) * (2.0 * sigma12 + C2)
        den = (mu1_sq + mu2_sq + C1) * (sigma1_sq + sigma2_sq + C2)
        ssim_map = num * pl.reciprocal(den, approx=False)

        if aligned:
            # Fold the (rows, wd) map into one (8, 128) vreg-shaped partial
            # using only aligned VPU adds (cheap filler under the matmuls).
            acc = jnp.zeros((8, 128), jnp.float32)
            for r0 in range(0, rows, 8):
                for c0 in range(0, wd, 128):
                    acc = acc + ssim_map[r0:r0 + 8, c0:c0 + 128]
            out_ref[0] = acc
        else:
            # Unaligned fallback: full reduce (XLU), spread uniformly so the
            # wrapper-side jnp.sum(partials) recovers the exact total.
            out_ref[0] = jnp.full((8, 128),
                                  jnp.sum(ssim_map) * (1.0 / 1024.0),
                                  jnp.float32)

    return kernel


def ssim3d_slices(pred, target):
    """pred, target: (B, C, H, W, D) float-like.

    Returns scalar mean SSIM over all B*D 2D slices (window 11, sigma 1.5,
    size_average=True) — same semantics as SSIM3DSlices.forward.
    """
    b, c, h, w, d = pred.shape
    assert target.shape == pred.shape
    ch = c * h
    wd = w * d

    # TODO(synk): pad/mask support for C*H not a multiple of 8 (sublane tiling).
    assert ch % 8 == 0, "C*H must be a multiple of 8 for this kernel"
    # TODO(synk): tile the W*D lane axis (halo-exchange blur) when W*D is too
    # large for a resident (wd, wd) R matrix in VMEM.

    # Batch entries per grid step: biggest divisor of B with rows <= 256
    # (single MXU contraction pass on v6e/v7x, bounds the Kron overhead),
    # while keeping >= 2 grid steps when B >= 2 so the "parallel" grid axis
    # can be sharded across TensorCores.
    tb = 1
    for cand in range(b, 0, -1):
        if b % cand == 0 and cand * ch <= 256 and (b // cand) >= min(2, b):
            tb = cand
            break
    rows = tb * ch
    nb = b // tb

    # Free reshapes (no transpose, no extra HBM traffic): lanes = (w, d).
    pred2 = pred.astype(jnp.float32).reshape(b * ch, wd)
    targ2 = target.astype(jnp.float32).reshape(b * ch, wd)

    ah = _conv_matrix(h)                       # (H, H)
    aw = _conv_matrix(w)                       # (W, W)
    lmat = jnp.asarray(np.kron(np.eye(tb * c, dtype=np.float32), ah))      # (rows, rows)
    rmat = jnp.asarray(np.kron(np.ascontiguousarray(aw.T),
                               np.eye(d, dtype=np.float32)))               # (wd, wd)

    kernel = _make_ssim_kernel(rows, wd)

    partials = pl.pallas_call(
        kernel,
        out_shape=jax.ShapeDtypeStruct((nb, 8, 128), jnp.float32),
        grid_spec=pltpu.PrefetchScalarGridSpec(
            num_scalar_prefetch=0,
            grid=(nb,),
            in_specs=[
                pl.BlockSpec((rows, wd), lambda i: (i, 0)),
                pl.BlockSpec((rows, wd), lambda i: (i, 0)),
                pl.BlockSpec((rows, rows), lambda i: (0, 0)),   # resident constant
                pl.BlockSpec((wd, wd), lambda i: (0, 0)),       # resident constant
            ],
            out_specs=pl.BlockSpec((1, 8, 128), lambda i: (i, 0, 0)),
        ),
        compiler_params=pltpu.CompilerParams(
            dimension_semantics=("parallel",)),
    )(pred2, targ2, lmat, rmat)

    denom = float(b * c * h * w * d)
    return jnp.sum(partials) / denom


def _reference_ssim(pred, target):
    # pure-JAX reference mirroring the PyTorch ssim on rearranged slices
    b, c, h, w, d = pred.shape
    n = b * d
    ps = jnp.transpose(pred, (0, 4, 1, 2, 3)).reshape(n, c, h, w)
    ts = jnp.transpose(target, (0, 4, 1, 2, 3)).reshape(n, c, h, w)
    ah = jnp.asarray(_conv_matrix(h))
    aw = jnp.asarray(_conv_matrix(w))

    def gconv(x):
        return jnp.einsum('ai,bj,ncij->ncab', ah, aw, x)

    mu1, mu2 = gconv(ps), gconv(ts)
    s11 = gconv(ps * ps) - mu1 * mu1
    s22 = gconv(ts * ts) - mu2 * mu2
    s12 = gconv(ps * ts) - mu1 * mu2
    m = ((2 * mu1 * mu2 + C1) * (2 * s12 + C2)) / (
        (mu1 * mu1 + mu2 * mu2 + C1) * (s11 + s22 + C2))
    return jnp.mean(m)


if __name__ == "__main__":
    key = jax.random.PRNGKey(0)
    k1, k2 = jax.random.split(key)
    B, C, H, W, D = 2, 4, 16, 16, 8
    pred = jax.random.uniform(k1, (B, C, H, W, D), dtype=jnp.float32)
    target = jnp.clip(pred + 0.05 * jax.random.normal(k2, (B, C, H, W, D)),
                      0.0, 1.0).astype(jnp.float32)

    out = ssim3d_slices(pred, target)
    out = jax.block_until_ready(out)

    ref = jax.block_until_ready(_reference_ssim(pred, target))
    assert jnp.isfinite(out), "non-finite SSIM"
    assert abs(float(out) - float(ref)) < 1e-4, (float(out), float(ref))
    print("KERNEL_OK")
</pallas_src>

<mosaic_0001>
module attributes {stable_mosaic.version = 11 : i64} {
  func.func @kernel(%arg0: i32, %arg1: memref<64x128xf32, #tpu.memory_space<vmem>>, %arg2: memref<64x128xf32, #tpu.memory_space<vmem>>, %arg3: memref<64x64xf32, #tpu.memory_space<vmem>>, %arg4: memref<128x128xf32, #tpu.memory_space<vmem>>, %arg5: memref<1x8x128xf32, #tpu.memory_space<vmem>>) attributes {dimension_semantics = [#tpu.dimension_semantics<parallel>], iteration_bounds = array<i64: 2>, scalar_prefetch = 0 : i64, scratch_operands = 0 : i64, tpu.core_type = #tpu.core_type<tc>, window_params = [{transform_indices = @transform_0, window_bounds = array<i64: 64, 128>}, {transform_indices = @transform_1, window_bounds = array<i64: 64, 128>}, {pipeline_mode = #tpu.pipeline_mode<synchronous>, transform_indices = @transform_2, window_bounds = array<i64: 64, 64>}, {pipeline_mode = #tpu.pipeline_mode<synchronous>, transform_indices = @transform_3, window_bounds = array<i64: 128, 128>}, {transform_indices = @transform_4, window_bounds = array<i64: 1, 8, 128>}]} {
    %c0 = arith.constant 0 : index
    %c0_0 = arith.constant 0 : index
    %0 = vector.load %arg1[%c0, %c0_0] : memref<64x128xf32, #tpu.memory_space<vmem>>, vector<64x128xf32>
    %c0_1 = arith.constant 0 : index
    %c0_2 = arith.constant 0 : index
    %1 = vector.load %arg2[%c0_1, %c0_2] : memref<64x128xf32, #tpu.memory_space<vmem>>, vector<64x128xf32>
    %c0_3 = arith.constant 0 : index
    %c0_4 = arith.constant 0 : index
    %2 = vector.load %arg3[%c0_3, %c0_4] : memref<64x64xf32, #tpu.memory_space<vmem>>, vector<64x64xf32>
    %c0_5 = arith.constant 0 : index
    %c0_6 = arith.constant 0 : index
    %3 = vector.load %arg4[%c0_5, %c0_6] : memref<128x128xf32, #tpu.memory_space<vmem>>, vector<128x128xf32>
    %cst = arith.constant dense<0.000000e+00> : vector<64x128xf32>
    %4 = tpu.matmul %2, %0, %cst {dimension_numbers = #tpu.dot_dimension_numbers<[1], [0], [0], [1], [0, 0, 1, 1], [], []>} : vector<64x64xf32>, vector<64x128xf32>, vector<64x128xf32> -> vector<64x128xf32>
    %cst_7 = arith.constant dense<0.000000e+00> : vector<64x128xf32>
    %5 = tpu.matmul %4, %3, %cst_7 {dimension_numbers = #tpu.dot_dimension_numbers<[1], [0], [0], [1], [0, 0, 1, 1], [], []>} : vector<64x128xf32>, vector<128x128xf32>, vector<64x128xf32> -> vector<64x128xf32>
    %cst_8 = arith.constant dense<0.000000e+00> : vector<64x128xf32>
    %6 = tpu.matmul %2, %1, %cst_8 {dimension_numbers = #tpu.dot_dimension_numbers<[1], [0], [0], [1], [0, 0, 1, 1], [], []>} : vector<64x64xf32>, vector<64x128xf32>, vector<64x128xf32> -> vector<64x128xf32>
    %cst_9 = arith.constant dense<0.000000e+00> : vector<64x128xf32>
    %7 = tpu.matmul %6, %3, %cst_9 {dimension_numbers = #tpu.dot_dimension_numbers<[1], [0], [0], [1], [0, 0, 1, 1], [], []>} : vector<64x128xf32>, vector<128x128xf32>, vector<64x128xf32> -> vector<64x128xf32>
    %8 = arith.mulf %5, %5 : vector<64x128xf32>
    %9 = arith.mulf %7, %7 : vector<64x128xf32>
    %10 = arith.mulf %5, %7 : vector<64x128xf32>
    %11 = arith.mulf %0, %0 : vector<64x128xf32>
    %cst_10 = arith.constant dense<0.000000e+00> : vector<64x128xf32>
    %12 = tpu.matmul %2, %11, %cst_10 {dimension_numbers = #tpu.dot_dimension_numbers<[1], [0], [0], [1], [0, 0, 1, 1], [], []>} : vector<64x64xf32>, vector<64x128xf32>, vector<64x128xf32> -> vector<64x128xf32>
    %cst_11 = arith.constant dense<0.000000e+00> : vector<64x128xf32>
    %13 = tpu.matmul %12, %3, %cst_11 {dimension_numbers = #tpu.dot_dimension_numbers<[1], [0], [0], [1], [0, 0, 1, 1], [], []>} : vector<64x128xf32>, vector<128x128xf32>, vector<64x128xf32> -> vector<64x128xf32>
    %14 = arith.subf %13, %8 : vector<64x128xf32>
    %15 = arith.mulf %1, %1 : vector<64x128xf32>
    %cst_12 = arith.constant dense<0.000000e+00> : vector<64x128xf32>
    %16 = tpu.matmul %2, %15, %cst_12 {dimension_numbers = #tpu.dot_dimension_numbers<[1], [0], [0], [1], [0, 0, 1, 1], [], []>} : vector<64x64xf32>, vector<64x128xf32>, vector<64x128xf32> -> vector<64x128xf32>
    %cst_13 = arith.constant dense<0.000000e+00> : vector<64x128xf32>
    %17 = tpu.matmul %16, %3, %cst_13 {dimension_numbers = #tpu.dot_dimension_numbers<[1], [0], [0], [1], [0, 0, 1, 1], [], []>} : vector<64x128xf32>, vector<128x128xf32>, vector<64x128xf32> -> vector<64x128xf32>
    %18 = arith.subf %17, %9 : vector<64x128xf32>
    %19 = arith.mulf %0, %1 : vector<64x128xf32>
    %cst_14 = arith.constant dense<0.000000e+00> : vector<64x128xf32>
    %20 = tpu.matmul %2, %19, %cst_14 {dimension_numbers = #tpu.dot_dimension_numbers<[1], [0], [0], [1], [0, 0, 1, 1], [], []>} : vector<64x64xf32>, vector<64x128xf32>, vector<64x128xf32> -> vector<64x128xf32>
    %cst_15 = arith.constant dense<0.000000e+00> : vector<64x128xf32>
    %21 = tpu.matmul %20, %3, %cst_15 {dimension_numbers = #tpu.dot_dimension_numbers<[1], [0], [0], [1], [0, 0, 1, 1], [], []>} : vector<64x128xf32>, vector<128x128xf32>, vector<64x128xf32> -> vector<64x128xf32>
    %22 = arith.subf %21, %10 : vector<64x128xf32>
    %cst_16 = arith.constant 2.000000e+00 : f32
    %23 = vector.broadcast %cst_16 : f32 to vector<64x128xf32>
    %24 = arith.mulf %23, %10 : vector<64x128xf32>
    %cst_17 = arith.constant 9.99999974E-5 : f32
    %25 = vector.broadcast %cst_17 : f32 to vector<64x128xf32>
    %26 = arith.addf %24, %25 : vector<64x128xf32>
    %cst_18 = arith.constant 2.000000e+00 : f32
    %27 = vector.broadcast %cst_18 : f32 to vector<64x128xf32>
    %28 = arith.mulf %27, %22 : vector<64x128xf32>
    %cst_19 = arith.constant 8.99999984E-4 : f32
    %29 = vector.broadcast %cst_19 : f32 to vector<64x128xf32>
    %30 = arith.addf %28, %29 : vector<64x128xf32>
    %31 = arith.mulf %26, %30 : vector<64x128xf32>
    %32 = arith.addf %8, %9 : vector<64x128xf32>
    %cst_20 = arith.constant 9.99999974E-5 : f32
    %33 = vector.broadcast %cst_20 : f32 to vector<64x128xf32>
    %34 = arith.addf %32, %33 : vector<64x128xf32>
    %35 = arith.addf %14, %18 : vector<64x128xf32>
    %cst_21 = arith.constant 8.99999984E-4 : f32
    %36 = vector.broadcast %cst_21 : f32 to vector<64x128xf32>
    %37 = arith.addf %35, %36 : vector<64x128xf32>
    %38 = arith.mulf %34, %37 : vector<64x128xf32>
    %39 = tpu.reciprocal %38 : vector<64x128xf32> -> vector<64x128xf32>
    %40 = arith.mulf %31, %39 : vector<64x128xf32>
    %cst_22 = arith.constant 0.000000e+00 : f32
    %41 = vector.broadcast %cst_22 : f32 to vector<8x128xf32>
    %42 = vector.extract_strided_slice %40 {offsets = [0, 0], sizes = [8, 128], strides = [1, 1]} : vector<64x128xf32> to vector<8x128xf32>
    %43 = arith.addf %41, %42 : vector<8x128xf32>
    %44 = vector.extract_strided_slice %40 {offsets = [8, 0], sizes = [8, 128], strides = [1, 1]} : vector<64x128xf32> to vector<8x128xf32>
    %45 = arith.addf %43, %44 : vector<8x128xf32>
    %46 = vector.extract_strided_slice %40 {offsets = [16, 0], sizes = [8, 128], strides = [1, 1]} : vector<64x128xf32> to vector<8x128xf32>
    %47 = arith.addf %45, %46 : vector<8x128xf32>
    %48 = vector.extract_strided_slice %40 {offsets = [24, 0], sizes = [8, 128], strides = [1, 1]} : vector<64x128xf32> to vector<8x128xf32>
    %49 = arith.addf %47, %48 : vector<8x128xf32>
    %50 = vector.extract_strided_slice %40 {offsets = [32, 0], sizes = [8, 128], strides = [1, 1]} : vector<64x128xf32> to vector<8x128xf32>
    %51 = arith.addf %49, %50 : vector<8x128xf32>
    %52 = vector.extract_strided_slice %40 {offsets = [40, 0], sizes = [8, 128], strides = [1, 1]} : vector<64x128xf32> to vector<8x128xf32>
    %53 = arith.addf %51, %52 : vector<8x128xf32>
    %54 = vector.extract_strided_slice %40 {offsets = [48, 0], sizes = [8, 128], strides = [1, 1]} : vector<64x128xf32> to vector<8x128xf32>
    %55 = arith.addf %53, %54 : vector<8x128xf32>
    %56 = vector.extract_strided_slice %40 {offsets = [56, 0], sizes = [8, 128], strides = [1, 1]} : vector<64x128xf32> to vector<8x128xf32>
    %57 = arith.addf %55, %56 : vector<8x128xf32>
    %c0_23 = arith.constant 0 : index
    %c0_24 = arith.constant 0 : index
    %c0_25 = arith.constant 0 : index
    %58 = vector.load %arg5[%c0_23, %c0_24, %c0_25] : memref<1x8x128xf32, #tpu.memory_space<vmem>>, vector<1x8x128xf32>
    %59 = vector.shape_cast %58 : vector<1x8x128xf32> to vector<8x128xf32>
    %60 = vector.shape_cast %57 : vector<8x128xf32> to vector<1x8x128xf32>
    tpu.vector_store %arg5[%c0_23, %c0_24, %c0_25], %60 {strides = array<i32>} : memref<1x8x128xf32, #tpu.memory_space<vmem>>, vector<1x8x128xf32>,
    return
  }
  func.func @transform_0(%arg0: i32) -> (i32, i32) {
    %c0_i32 = arith.constant 0 : i32
    %c0_i32_0 = arith.constant 0 : i32
    return %arg0, %c0_i32 : i32, i32
  }
  func.func @transform_1(%arg0: i32) -> (i32, i32) {
    %c0_i32 = arith.constant 0 : i32
    %c0_i32_0 = arith.constant 0 : i32
    return %arg0, %c0_i32 : i32, i32
  }
  func.func @transform_2(%arg0: i32) -> (i32, i32) {
    %c0_i32 = arith.constant 0 : i32
    %c0_i32_0 = arith.constant 0 : i32
    %c0_i32_1 = arith.constant 0 : i32
    return %c0_i32, %c0_i32_0 : i32, i32
  }
  func.func @transform_3(%arg0: i32) -> (i32, i32) {
    %c0_i32 = arith.constant 0 : i32
    %c0_i32_0 = arith.constant 0 : i32
    %c0_i32_1 = arith.constant 0 : i32
    return %c0_i32, %c0_i32_0 : i32, i32
  }
  func.func @transform_4(%arg0: i32) -> (i32, i32, i32) {
    %c0_i32 = arith.constant 0 : i32
    %c0_i32_0 = arith.constant 0 : i32
    %c0_i32_1 = arith.constant 0 : i32
    return %arg0, %c0_i32, %c0_i32_0 : i32, i32, i32
  }
}

</mosaic_0001>

<bundles_post_ra>
// kernel: tpu_custom_call.1
= control target key start
LH: loop header
LB: loop body
LE: loop exit
PB: predicated region body
PF: predicated region fallthrough
CT: control target
= control target key end

     0   :  { %s2240_s0 = inlined_call_operand.hbm [shape: f32[128,128], index: 0, kind: input, shape index: {}]   ;;  %s2241_s1 = inlined_call_operand.hbm [shape: f32[128,128], index: 1, kind: input, shape index: {}]   ;;  %s2242_s2 = inlined_call_operand.hbm [shape: f32[64,64], index: 2, kind: input, shape index: {}]   ;;  %s2243_s3 = inlined_call_operand.hbm [shape: f32[128,128], index: 3, kind: input, shape index: {}]   ;;  %s2244_s4 = inlined_call_operand.hbm [shape: f32[2,8,128], index: 4, kind: output, shape index: {}]  }
   0x1   :  { %2249 = sst [smem:[#allocation16_spill]] %s2240_s0 }
   0x2   :  { %2250 = sst [smem:[#allocation17_spill]] %s2242_s2 }
   0x3   :  { %2251 = sst [smem:[#allocation18_spill]] %s2243_s3 }
   0x4   :  { %9 = vsyncpa [#allocation3], 0 }
   0x5   :  { %11 = vsyncpa [#allocation3 + $0x1], 0 }
   0x6   :  { %12 = vsyncpa [#allocation6], 0 }
   0x7   :  { %14 = vsyncpa [#allocation6 + $0x1], 0 }
   0x8   :  { %15 = vsyncpa [#allocation9], 0 }
   0x9   :  { %16 = vsyncpa [#allocation4], 0 }
   0xa   :  { %18 = vsyncpa [#allocation4 + $0x1], 0  ;;  %s1577_s15 = smov 0   ;;  %s1579_s16 = smov 0  }
   0xb   :  { %s1581_s17 = smov 0   ;;  %s1583_s18 = smov 0  }
   0xc LB: > { %s1598_s19 = sadd.s32 4294967295, %s1546_s18   ;;  %s1179_s20 = sadd.s32 4294967294, %s1546_s18   ;;  %s1546_s18 = sphi %s1583_s18, %s2266_s18   ;;  %s1542_s17 = sphi %s1581_s17, %s2265_s17   ;;  %s1538_s16 = sphi %s1579_s16, %s2264_s16   ;;  %s1534_s15 = sphi %s1577_s15, %s2263_s15  }
   0xd   : > { %p44_p0 = scmp.ne.s32.totalorder %s1538_s16, %s1534_s15  ;;  %p45_p1 = scmp.eq.s32.totalorder %s1598_s19, 0 }
   0xe   : > { %p136_p2 = scmp.eq.s32.totalorder %s1598_s19, 1  ;;  %p142_p3 = scmp.eq.s32.totalorder %s1179_s20, 1 }
   0xf   : > { %p1607_p4 = por %p45_p1, %p44_p0  ;;  %p1180_p5 = scmp.ge.s32.totalorder %s1546_s18, 1 }
  0x10   : > { %p1612_p6 = por %p142_p3, %p44_p0  ;;  %p149_p7 = scmp.lt.s32.totalorder %s1546_s18, 3 }
  0x11   : > { %s2254_s2 = sld [smem:[#allocation17_spill]]  ;;  %s1548_s27 = smov [#allocation7]  }
  0x12   : > { %p1620_p8 = pnand %p1180_p5, %p149_p7  ;;  %s162_s28 = sshll.u32 %s1548_s27, 4  ;;  %s163_s28 = int_to_ptr.vmem [resolvable:$true] %s162_s28 }
  0x13   : > { %s2256_s3 = sld [smem:[#allocation18_spill]]  ;;  %s2245_s6 = smov 128  }
  0x14   : > { %p1272_p9 = pneg %p1620_p8  ;;  %s2247_s7 = smov 8  }
  0x15   : > { %s1551_s8 = smov [#allocation8]   ;;  %s1639_s10 = sadd.s32 1, %s1546_s18  }
  0x16   : > { %p1273_p10 = pnand %p1272_p9, %p45_p1  ;;  %s176_s9 = sshll.u32 %s1551_s8, 4  ;;  %s177_s9 = int_to_ptr.vmem [resolvable:$true] %s176_s9 }
  0x17   : > { %s160_s25 = sshll.u32 %s2254_s2, 4  ;;  %s31_s11 = sadd.s32 1, %s1542_s17  ;;  %s161_s25 = int_to_ptr.hbm [resolvable:$true] %s160_s25 }
  0x18   : > { %1275 = dma.hbm_to_vmem [thread:$0]  (!%p1273_p10), %s161_s25, 1024, %s163_s28, [#allocation6], %s2245_s6, %s2245_s6, %s2247_s7  }
  0x19   : > { %s174_s5 = sshll.u32 %s2256_s3, 4  ;;  %s28_s12 = ssub.s32 %s1546_s18, %s1639_s10  ;;  %s175_s5 = int_to_ptr.hbm [resolvable:$true] %s174_s5 }
  0x1a   : > { %1278 = dma.hbm_to_vmem [thread:$0]  (!%p1273_p10), %s175_s5, 2048, %s177_s9, [#allocation9], %s2245_s6, %s2245_s6, %s2247_s7  }
  0x1b   : > { %p38_p12 = scmp.ne.s32.totalorder %s1542_s17, %s1538_s16  ;;  %p29_p13 = scmp.eq.s32.totalorder %s28_s12, 0 }
  0x1c   : > { %p39_p0 = scmp.eq.s32.totalorder %s1546_s18, 0  ;;  %p1292_p5 = scmp.lt.s32.totalorder %s1546_s18, 2 }
  0x1d   : > { %p1649_p3 = por %p136_p2, %p38_p12  ;;  %s190_s20 = sand.u32 1, %s1542_s17  }
  0x1e   : > { %s1655_s14 = scalar_select %p29_p13, %s1542_s17, %s31_s11  }
  0x1f   : > { %p40_p7 = por %p39_p0, %p38_p12  ;;  %s1658_s23 = sshll.u32 %s190_s20, 6 }
  0x20   : > { %s1240_s24 = sshll.u32 %s1546_s18, 6  ;;  %s2258_s0 = sld [smem:[#allocation16_spill]] }
  0x21   : > { %s194_s29 = scalar_lea.vmem [#allocation2], %s1658_s23  ;;  %p1665_p2 = pnand %p1292_p5, %p40_p7 }
  0x22   : > { %s202_s30 = sshll.u32 %s194_s29, 4  ;;  %s221_s12 = scalar_lea.hbm %s2241_s1, %s1240_s24  ;;  %s203_s30 = int_to_ptr.vmem [resolvable:$true] %s202_s30 }
  0x23   : > { %s222_s6 = sshll.u32 %s221_s12, 4  ;;  %s191_s7 = scalar_lea.sflag [#allocation3], %s190_s20  ;;  %s223_s6 = int_to_ptr.hbm [resolvable:$true] %s222_s6 }
  0x24   : > { %p1412_p10 = pneg %p1665_p2 }
  0x26   : > { %s199_s28 = scalar_lea.hbm %s2258_s0, %s1240_s24  ;;  %s1415_s29 = scalar_lea.hbm %s2258_s0, 128 }
  0x27   : > { %s200_s5 = sshll.u32 %s199_s28, 4  ;;  %s201_s5 = int_to_ptr.hbm [resolvable:$true] %s200_s5 }
  0x28   : > { %s1408_s2 = sshra.s32 %s201_s5, 4  ;;  %s1409_s2 = int_to_ptr.hbm [resolvable:$true] %s1408_s2 }
  0x29   : > { %s1410_s25 = scalar_lea.hbm %s1409_s2, 64  ;;  %p1416_p0 = scmp.lt.s32.totalorder %s1409_s2, %s2258_s0 }
  0x2a   : > { %p1411_p9 = scmp.ne.s32.totalorder %s1409_s2, %s1410_s25  ;;  %p1417_p5 = scmp.lt.s32.totalorder %s1415_s29, %s1410_s25 }
  0x2c   : > { %p1413_p12 = pnand %p1412_p10, %p1411_p9  ;;  %p1418_p7 = por %p1417_p5, %p1416_p0 }
  0x2e   : > { %p1414_p13 = pneg %p1413_p12 }
  0x30   : > { %p1419_p11 = pnand %p1418_p7, %p1414_p13 }
  0x32   : > { %1422 = shalt.err (!%p1419_p11)
}
  0x33   : > { %s2260_s20 = smov 8   ;;  %s2261_s24 = smov 128  }
  0x34   : > { %1282 = dma.hbm_to_vmem [thread:$0]  (!%p1665_p2), %s201_s5, 1024, %s203_s30, %s191_s7, %s2261_s24, %s2261_s24, %s2260_s20  }
  0x35   : > { %s216_s12 = scalar_lea.vmem [#allocation5], %s1658_s23  ;;  %s212_s28 = sand.u32 1, %s1546_s18  }
  0x36   : > { %s224_s27 = sshll.u32 %s216_s12, 4  ;;  %s213_s9 = scalar_lea.sflag [#allocation6], %s212_s28  ;;  %s225_s27 = int_to_ptr.vmem [resolvable:$true] %s224_s27 }
  0x37   : > { %s1438_s2 = sshra.s32 %s223_s6, 4  ;;  %s1445_s0 = scalar_lea.hbm %s2241_s1, 128  ;;  %s1439_s2 = int_to_ptr.hbm [resolvable:$true] %s1438_s2 }
  0x38   : > { %s1440_s25 = scalar_lea.hbm %s1439_s2, 64  ;;  %p1446_p13 = scmp.lt.s32.totalorder %s1439_s2, %s2241_s1 }
  0x39   : > { %p1441_p9 = scmp.ne.s32.totalorder %s1439_s2, %s1440_s25  ;;  %p1447_p0 = scmp.lt.s32.totalorder %s1445_s0, %s1440_s25 }
  0x3b   : > { %p1443_p11 = pnand %p1441_p9, %p1412_p10  ;;  %p1448_p5 = por %p1447_p0, %p1446_p13 }
  0x3d   : > { %p1444_p12 = pneg %p1443_p11 }
  0x3f   : > { %p1449_p7 = pnand %p1448_p5, %p1444_p12 }
  0x41   : > { %1452 = shalt.err (!%p1449_p7)
}
  0x42   : > { %1285 = dma.hbm_to_vmem [thread:$0]  (!%p1665_p2), %s223_s6, 1024, %s225_s27, %s213_s9, %s2261_s24, %s2261_s24, %s2260_s20  }
  0x43   : > { %236 = sbr.rel (%p1620_p8) target bundleno = 656 (0x290), region = 36  ;;  %s1707_s23 = sand.u32 (!%p1620_p8), 1, %s1538_s16  }
  0x44   : > { %s1191_s3 = sshll.u32 (!%p1620_p8), %s1707_s23, 6  ;;  %s239_s0 = scalar_lea.sflag (!%p1620_p8), [#allocation3], %s1707_s23 }
  0x45   : > { %s1711_s30 = scalar_lea.vmem (!%p1620_p8), [#allocation2], %s1191_s3 }
  0x48   : > { %1513 = dma.done.wait (%p1607_p4), %s239_s0, 1024  }
  0x49   : > { %1515 = vsyncadd (%p1607_p4), %s239_s0, 4294966272  ;;  %s248_s6 = sand.u32 1, %s1598_s19   ;;  %s1718_s5 = scalar_lea.vmem [#allocation5], %s1191_s3 }
  0x4a   : > { %s249_s26 = scalar_lea.sflag [#allocation6], %s248_s6 }
  0x4b   : > { %1517 = dma.done.wait (%p1607_p4), %s249_s26, 1024  }
  0x4c   : > { %1519 = vsyncadd (%p1607_p4), %s249_s26, 4294966272 }
  0x4d   : > { %1521 = dma.done.wait (%p45_p1), [#allocation6], 1024  }
  0x4e   : > { %1523 = vsyncadd (%p45_p1), [#allocation6], 4294966272 }
  0x4f   : > { %1525 = dma.done.wait (%p45_p1), [#allocation9], 2048  }
  0x50   : > { %1527 = vsyncadd (%p45_p1), [#allocation9], 4294965248  ;;  %v1733_v0 = vld [vmem:[%s1711_s30 + $0x38] sm:$0xff]  ;;  %v1739_v2 = vld [vmem:[%s1711_s30 + $0x30] sm:$0xff]  ;;  %vm335_vm0 = vcmask 523264   ;;  %s1195_s21 = sshll.u32 %s1707_s23, 3 }
  0x51   : > { %v1736_v1 = vld [vmem:[%s1718_s5 + $0x38] sm:$0xff]  ;;  %368 = vmatpush.msra.mxu0 %v1733_v0  ;;  %v1744_v3 = vld [vmem:[%s1718_s5 + $0x30] sm:$0xff]  ;;  %v1747_v4 = vld [vmem:[%s1711_s30 + $0x28] sm:$0xff]  ;;  %v1830_v22 = vmul.f32 %v1733_v0, %v1733_v0  ;;  %v1838_v23 = vmul.f32 %v1739_v2, %v1739_v2  ;;  %s1237_s8 = sshll.u32 %s1598_s19, 3  ;;  %s292_s19 = scalar_lea.vmem [#allocation10], %s1195_s21 }
  0x52   : > { %450 = vmatpush.msra.mxu2 %v1736_v1  ;;  %v1750_v5 = vld [vmem:[%s1718_s5 + $0x28] sm:$0xff]  ;;  %1242 = vmatpush.msra.mxu3 %v1736_v1  ;;  %v1756_v6 = vld [vmem:[%s1711_s30 + $0x20] sm:$0xff]  ;;  %v1765_v8 = vld [vmem:[%s1711_s30 + $0x18] sm:$0xff]  ;;  %v1843_v24 = vmul.f32 %v1747_v4, %v1747_v4  ;;  %v653_v58 = vmul.f32 %v1736_v1, %v1736_v1  ;;  %v751_v59 = vmul.f32 %v1736_v1, %v1733_v0  ;;  %s1062_s12 = scalar_lea.hbm %s2244_s4, %s1237_s8  ;;  %s1064_s27 = sshll.u32 %s292_s19, 4  ;;  %s1065_s27 = int_to_ptr.vmem [resolvable:$true] %s1064_s27 }
  0x53   : > { %369 = vmatpush.msra.mxu0 %v1739_v2  ;;  %v1759_v7 = vld [vmem:[%s1718_s5 + $0x20] sm:$0xff]  ;;  %v1768_v9 = vld [vmem:[%s1718_s5 + $0x18] sm:$0xff]  ;;  %v1774_v10 = vld [vmem:[%s1711_s30 + $0x10] sm:$0xff]  ;;  %v1850_v25 = vmul.f32 %v1756_v6, %v1756_v6  ;;  %v1860_v28 = vmul.f32 %v1765_v8, %v1765_v8  ;;  %v652_v60 = vmul.f32 %v1744_v3, %v1744_v3  ;;  %v750_v61 = vmul.f32 %v1744_v3, %v1739_v2  ;;  %s1066_s28 = sshll.u32 %s1062_s12, 4  ;;  %s1052_s9 = scalar_lea.sflag [#allocation4], %s1707_s23  ;;  %s1067_s28 = int_to_ptr.hbm [resolvable:$true] %s1066_s28 }
  0x54   : > { %451 = vmatpush.msra.mxu2 %v1744_v3  ;;  %1243 = vmatpush.msra.mxu3 %v1744_v3  ;;  %v1777_v11 = vld [vmem:[%s1718_s5 + $0x10] sm:$0xff]  ;;  %v1783_v12 = vld [vmem:[%s1711_s30 + $0x8] sm:$0xff]  ;;  %v1792_v14 = vld [vmem:[%s1711_s30] sm:$0xff]  ;;  %v1868_v29 = vmul.f32 %v1774_v10, %v1774_v10  ;;  %v651_v62 = vmul.f32 %v1750_v5, %v1750_v5  ;;  %v650_v0 = vmul.f32 %v1759_v7, %v1759_v7  ;;  %s1482_s2 = sshra.s32 %s1067_s28, 4  ;;  %s1488_s7 = scalar_lea.hbm %s2244_s4, 16  ;;  %s1483_s2 = int_to_ptr.hbm [resolvable:$true] %s1482_s2 }
  0x55   : > { %370 = vmatpush.msra.mxu0 %v1747_v4  ;;  %v1786_v13 = vld [vmem:[%s1718_s5 + $0x8] sm:$0xff]  ;;  %v1795_v15 = vld [vmem:[%s1718_s5] sm:$0xff]  ;;  %v1824_v20 = vld [vmem:[#allocation7 + $0x10] sm:$0xff]  ;;  %v1873_v30 = vmul.f32 %v1783_v12, %v1783_v12  ;;  %v1880_v31 = vmul.f32 %v1792_v14, %v1792_v14  ;;  %v749_v1 = vmul.f32 %v1750_v5, %v1747_v4  ;;  %v649_v2 = vmul.f32 %v1768_v9, %v1768_v9  ;;  %s1484_s25 = scalar_lea.hbm %s1483_s2, 8  ;;  %p1489_p2 = scmp.lt.s32.totalorder %s1483_s2, %s2244_s4 }
  0x56   : > { %452 = vmatpush.msra.mxu2 %v1750_v5  ;;  %1244 = vmatpush.msra.mxu3 %v1750_v5  ;;  %v1800_v16 = vld [vmem:[#allocation7] sm:$0xff]  ;;  %v1814_v18 = vld [vmem:[#allocation7 + $0x8] sm:$0xff]  ;;  %v1826_v21 = vld [vmem:[#allocation7 + $0x30] sm:$0xff]  ;;  %v748_v3 = vmul.f32 %v1759_v7, %v1756_v6  ;;  %v647_v4 = vmul.f32 %v1786_v13, %v1786_v13  ;;  %v746_v5 = vmul.f32 %v1777_v11, %v1774_v10  ;;  %p1485_p1 = scmp.ne.s32.totalorder %s1483_s2, %s1484_s25  ;;  %p1490_p10 = scmp.lt.s32.totalorder %s1488_s7, %s1484_s25 }
  0x57   : > { %371 = vmatpush.msra.mxu0 %v1756_v6  ;;  %v1805_v17 = vld [vmem:[#allocation7 + $0x20] sm:$0xff]  ;;  %v1816_v19 = vld [vmem:[#allocation7 + $0x28] sm:$0xff]  ;;  %v1852_v26 = vld [vmem:[#allocation7 + $0x18] sm:$0xff]  ;;  %v646_v6 = vmul.f32 %v1795_v15, %v1795_v15 }
  0x58   : > { %453 = vmatpush.msra.mxu2 %v1759_v7  ;;  %1245 = vmatpush.msra.mxu3 %v1759_v7  ;;  %v1856_v27 = vld [vmem:[#allocation7 + $0x38] sm:$0xff]  ;;  %v1899_v33 = vld [vmem:[#allocation8 + $0x70] sm:$0xff]  ;;  %v1901_v34 = vld [vmem:[#allocation8 + $0x68] sm:$0xff]  ;;  %v745_v7 = vmul.f32 %v1786_v13, %v1783_v12  ;;  %p1486_p4 = pnand %p1485_p1, %p1649_p3  ;;  %p1491_p9 = por %p1490_p10, %p1489_p2 }
  0x59   : > { %372 = vmatpush.msra.mxu0 %v1765_v8  ;;  %v1892_v32 = vld [vmem:[#allocation8 + $0x78] sm:$0xff]  ;;  %v1905_v35 = vld [vmem:[#allocation8 + $0x60] sm:$0xff]  ;;  %v1915_v37 = vld [vmem:[#allocation8 + $0x50] sm:$0xff] }
  0x5a   : > { %454 = vmatpush.msra.mxu2 %v1768_v9  ;;  %1246 = vmatpush.msra.mxu3 %v1768_v9  ;;  %v1910_v36 = vld [vmem:[#allocation8 + $0x58] sm:$0xff]  ;;  %v1922_v38 = vld [vmem:[#allocation8 + $0x48] sm:$0xff]  ;;  %v1927_v39 = vld [vmem:[#allocation8 + $0x40] sm:$0xff]  ;;  %p1487_p8 = pneg %p1486_p4 }
  0x5b   : > { %373 = vmatpush.msra.mxu0 %v1774_v10  ;;  %401 = vmatpush.msra.mxu1 %v1892_v32  ;;  %v1932_v40 = vld [vmem:[#allocation8 + $0x38] sm:$0xff]  ;;  %v325_v41 = vld [vmem:[#allocation8 + $0x30] sm:$0xff]  ;;  %v324_v42 = vld [vmem:[#allocation8 + $0x28] sm:$0xff] }
  0x5c   : > { %455 = vmatpush.msra.mxu2 %v1777_v11  ;;  %1247 = vmatpush.msra.mxu3 %v1777_v11  ;;  %v323_v43 = vld [vmem:[#allocation8 + $0x20] sm:$0xff]  ;;  %v322_v44 = vld [vmem:[#allocation8 + $0x18] sm:$0xff]  ;;  %v321_v45 = vld [vmem:[#allocation8 + $0x10] sm:$0xff]  ;;  %p1492_p11 = pnand %p1491_p9, %p1487_p8 }
  0x5d   : > { %374 = vmatpush.msra.mxu0 %v1783_v12  ;;  %402 = vmatpush.msra.mxu1 %v1899_v33  ;;  %v320_v46 = vld [vmem:[#allocation8 + $0x8] sm:$0xff]  ;;  %v319_v47 = vld [vmem:[#allocation8] sm:$0xff] }
  0x5e   : > { %456 = vmatpush.msra.mxu2 %v1786_v13  ;;  %1248 = vmatpush.msra.mxu3 %v1786_v13 }
  0x5f   : > { %375 = vmatpush.msra.mxu0 %v1792_v14  ;;  %403 = vmatpush.msra.mxu1 %v1901_v34 }
  0x60   : > { %457 = vmatpush.msra.mxu2 %v1795_v15  ;;  %1196 = vmatmul.msk.f32.vlgmr.msra.gmra.mxu0 %vm335_vm0, %v1800_v16 }
  0x61   : > { %1204 = vmatmul.msk.f32.vlgmr.msra.gmra.mxu2 %vm335_vm0, %v1800_v16  ;;  %1249 = vmatpush.msra.mxu3 %v1795_v15 }
  0x62   : > { %1208 = vmatmul.msk.f32.vlgmr.msra.gmra.mxu3 %vm335_vm0, %v1805_v17  ;;  %564 = vmatpush.msrb.mxu0 %v1830_v22 }
  0x63   : > { %483 = vmatpush.msrb.mxu3 %v1892_v32  ;;  %597 = vmatpush.msrb.mxu2 %v1892_v32 }
  0x64   : > { %565 = vmatpush.msrb.mxu0 %v1838_v23  ;;  %404 = vmatpush.msra.mxu1 %v1905_v35 }
  0x65   : > { %484 = vmatpush.msrb.mxu3 %v1899_v33  ;;  %598 = vmatpush.msrb.mxu2 %v1899_v33 }
  0x66   : > { %566 = vmatpush.msrb.mxu0 %v1843_v24  ;;  %405 = vmatpush.msra.mxu1 %v1910_v36 }
  0x67   : > { %485 = vmatpush.msrb.mxu3 %v1901_v34  ;;  %599 = vmatpush.msrb.mxu2 %v1901_v34 }
  0x68   : > { %1197 = vmatmul.msk.f32.gmra.mxu0 %vm335_vm0, %v1814_v18  ;;  %406 = vmatpush.msra.mxu1 %v1915_v37 }
  0x69   : > { %1205 = vmatmul.msk.f32.gmra.mxu2 %vm335_vm0, %v1814_v18  ;;  %567 = vmatpush.msrb.mxu0 %v1850_v25 }
  0x6a   : > { %1209 = vmatmul.msk.f32.gmra.mxu3 %vm335_vm0, %v1816_v19  ;;  %600 = vmatpush.msrb.mxu2 %v1905_v35 }
  0x6b   : > { %568 = vmatpush.msrb.mxu0 %v1860_v28  ;;  %486 = vmatpush.msrb.mxu3 %v1905_v35 }
  0x6c   : > { %601 = vmatpush.msrb.mxu2 %v1910_v36  ;;  %407 = vmatpush.msra.mxu1 %v1922_v38 }
  0x6d   : > { %569 = vmatpush.msrb.mxu0 %v1868_v29  ;;  %487 = vmatpush.msrb.mxu3 %v1910_v36 }
  0x6e   : > { %602 = vmatpush.msrb.mxu2 %v1915_v37  ;;  %408 = vmatpush.msra.mxu1 %v1927_v39 }
  0x6f   : > { %570 = vmatpush.msrb.mxu0 %v1873_v30  ;;  %488 = vmatpush.msrb.mxu3 %v1915_v37 }
  0x70   : > { %1198 = vmatmul.msk.f32.gmra.mxu0 %vm335_vm0, %v1824_v20  ;;  %603 = vmatpush.msrb.mxu2 %v1922_v38 }
  0x71   : > { %1206 = vmatmul.msk.f32.gmra.mxu2 %vm335_vm0, %v1824_v20  ;;  %571 = vmatpush.msrb.mxu0 %v1880_v31 }
  0x72   : > { %1210 = vmatmul.msk.f32.gmra.mxu3 %vm335_vm0, %v1826_v21  ;;  %604 = vmatpush.msrb.mxu2 %v1927_v39 }
  0x73   : > { %489 = vmatpush.msrb.mxu3 %v1922_v38  ;;  %409 = vmatpush.msra.mxu1 %v1932_v40 }
  0x74   : > { %605 = vmatpush.msrb.mxu2 %v1932_v40  ;;  %760 = vmatpush.msra.mxu0 %v751_v59 }
  0x75   : > { %490 = vmatpush.msrb.mxu3 %v1927_v39  ;;  %410 = vmatpush.msra.mxu1 %v325_v41 }
  0x76   : > { %606 = vmatpush.msrb.mxu2 %v325_v41  ;;  %761 = vmatpush.msra.mxu0 %v750_v61 }
  0x77   : > { %491 = vmatpush.msrb.mxu3 %v1932_v40  ;;  %411 = vmatpush.msra.mxu1 %v324_v42 }
  0x78   : > { %1199 = vmatmul.msk.f32.gmra.mxu0 %vm335_vm0, %v1852_v26  ;;  %607 = vmatpush.msrb.mxu2 %v324_v42 }
  0x79   : > { %1207 = vmatmul.msk.f32.gmra.mxu2 %vm335_vm0, %v1852_v26  ;;  %492 = vmatpush.msrb.mxu3 %v325_v41 }
  0x7a   : > { %1211 = vmatmul.msk.f32.gmra.mxu3 %vm335_vm0, %v1856_v27  ;;  %412 = vmatpush.msra.mxu1 %v323_v43 }
  0x7b   : > { %493 = vmatpush.msrb.mxu3 %v324_v42  ;;  %608 = vmatpush.msrb.mxu2 %v323_v43 }
  0x7c   : > { %413 = vmatpush.msra.mxu1 %v322_v44  ;;  %762 = vmatpush.msra.mxu0 %v749_v1 }
  0x7d   : > { %494 = vmatpush.msrb.mxu3 %v323_v43  ;;  %609 = vmatpush.msrb.mxu2 %v322_v44 }
  0x7e   : > { %414 = vmatpush.msra.mxu1 %v321_v45  ;;  %763 = vmatpush.msra.mxu0 %v748_v3 }
  0x7f   : > { %495 = vmatpush.msrb.mxu3 %v322_v44  ;;  %610 = vmatpush.msrb.mxu2 %v321_v45 }
  0x80   : > { %1200 = vmatmul.msk.f32.gmra.mxu0 %vm335_vm0, %v1805_v17  ;;  %415 = vmatpush.msra.mxu1 %v320_v46 }
  0x81   : > { %496 = vmatpush.msrb.mxu3 %v321_v45  ;;  %611 = vmatpush.msrb.mxu2 %v320_v46 }
  0x82   : > { %416 = vmatpush.msra.mxu1 %v319_v47 }
  0x83   : > { %497 = vmatpush.msrb.mxu3 %v320_v46  ;;  %612 = vmatpush.msrb.mxu2 %v319_v47 }
  0x84   : > { %1250 = vmatpush.msrb.mxu1 %v1830_v22 }
  0x85   : > { %498 = vmatpush.msrb.mxu3 %v319_v47  ;;  %793 = vmatpush.msra.mxu2 %v1892_v32 }
  0x86   : > { %1251 = vmatpush.msrb.mxu1 %v1838_v23 }
  0x87   : > { %695 = vmatpush.msra.mxu3 %v1892_v32  ;;  %794 = vmatpush.msra.mxu2 %v1899_v33 }
  0x88   : > { %1201 = vmatmul.msk.f32.gmra.mxu0 %vm335_vm0, %v1816_v19  ;;  %1252 = vmatpush.msrb.mxu1 %v1843_v24  ;;  %v648_v24 = vmul.f32 %v1777_v11, %v1777_v11 }
  0x89   : > { %696 = vmatpush.msra.mxu3 %v1899_v33  ;;  %795 = vmatpush.msra.mxu2 %v1901_v34 }
  0x8a   : > { %1253 = vmatpush.msrb.mxu1 %v1850_v25  ;;  %v747_v25 = vmul.f32 %v1768_v9, %v1765_v8  ;;  %v744_v8 = vmul.f32 %v1795_v15, %v1792_v14 }
  0x8b   : > { %697 = vmatpush.msra.mxu3 %v1901_v34  ;;  %796 = vmatpush.msra.mxu2 %v1905_v35 }
  0x8c   : > { %1254 = vmatpush.msrb.mxu1 %v1860_v28  ;;  %764 = vmatpush.msra.mxu0 %v747_v25 }
  0x8d   : > { %698 = vmatpush.msra.mxu3 %v1905_v35  ;;  %797 = vmatpush.msra.mxu2 %v1910_v36 }
  0x8e   : > { %1255 = vmatpush.msrb.mxu1 %v1868_v29  ;;  %765 = vmatpush.msra.mxu0 %v746_v5 }
  0x8f   : > { %699 = vmatpush.msra.mxu3 %v1910_v36  ;;  %798 = vmatpush.msra.mxu2 %v1915_v37 }
  0x90   : > { %1202 = vmatmul.msk.f32.gmra.mxu0 %vm335_vm0, %v1826_v21  ;;  %1256 = vmatpush.msrb.mxu1 %v1873_v30 }
  0x91   : > { %700 = vmatpush.msra.mxu3 %v1915_v37  ;;  %799 = vmatpush.msra.mxu2 %v1922_v38 }
  0x92   : > { %1257 = vmatpush.msrb.mxu1 %v1880_v31  ;;  %766 = vmatpush.msra.mxu0 %v745_v7 }
  0x93   : > { %701 = vmatpush.msra.mxu3 %v1922_v38  ;;  %800 = vmatpush.msra.mxu2 %v1927_v39 }
  0x94   : > { %767 = vmatpush.msra.mxu0 %v744_v8 }
  0x95   : > { %702 = vmatpush.msra.mxu3 %v1927_v39  ;;  %801 = vmatpush.msra.mxu2 %v1932_v40 }
  0x97   : > { %703 = vmatpush.msra.mxu3 %v1932_v40  ;;  %802 = vmatpush.msra.mxu2 %v325_v41 }
  0x98   : > { %1203 = vmatmul.msk.f32.gmra.mxu0 %vm335_vm0, %v1856_v27 }
  0x99   : > { %704 = vmatpush.msra.mxu3 %v325_v41  ;;  %803 = vmatpush.msra.mxu2 %v324_v42 }
  0x9b   : > { %705 = vmatpush.msra.mxu3 %v324_v42  ;;  %804 = vmatpush.msra.mxu2 %v323_v43 }
  0x9d   : > { %706 = vmatpush.msra.mxu3 %v323_v43  ;;  %805 = vmatpush.msra.mxu2 %v322_v44 }
  0x9f   : > { %707 = vmatpush.msra.mxu3 %v322_v44  ;;  %806 = vmatpush.msra.mxu2 %v321_v45 }
  0xa0   : > { %1212 = vmatmul.msk.f32.vlgmr.msrb.gmra.mxu0 %vm335_vm0, %v1800_v16 }
  0xa1   : > { %708 = vmatpush.msra.mxu3 %v321_v45  ;;  %807 = vmatpush.msra.mxu2 %v320_v46 }
  0xa3   : > { %709 = vmatpush.msra.mxu3 %v320_v46  ;;  %808 = vmatpush.msra.mxu2 %v319_v47 }
  0xa5   : > { %710 = vmatpush.msra.mxu3 %v319_v47 }
  0xa8   : > { %1213 = vmatmul.msk.f32.gmra.mxu0 %vm335_vm0, %v1814_v18 }
  0xb0   : > { %1214 = vmatmul.msk.f32.gmra.mxu0 %vm335_vm0, %v1824_v20 }
  0xb8   : > { %1215 = vmatmul.msk.f32.gmra.mxu0 %vm335_vm0, %v1852_v26 }
  0xc0   : > { %1216 = vmatmul.msk.f32.gmra.mxu0 %vm335_vm0, %v1805_v17 }
  0xc8   : > { %1228 = vmatmul.msk.f32.vlgmr.msra.gmra.mxu0 %vm335_vm0, %v1800_v16 }
  0xd0   : > { %1229 = vmatmul.msk.f32.gmra.mxu0 %vm335_vm0, %v1814_v18 }
  0xd8   : > { %1230 = vmatmul.msk.f32.gmra.mxu0 %vm335_vm0, %v1824_v20 }
  0xdd   : > { %v377_v48 = vpop.f32.mrf.mxu0 }
  0xde   : > { %417 = vmatmul.f32.vlgmr.msra.gmra.mxu1 %v377_v48 }
  0xdf   : > { %662 = vmatpush.msra.mxu1 %v653_v58 }
  0xe0   : > { %1231 = vmatmul.msk.f32.gmra.mxu0 %vm335_vm0, %v1852_v26 }
  0xe1   : > { %663 = vmatpush.msra.mxu1 %v652_v60 }
  0xe3   : > { %664 = vmatpush.msra.mxu1 %v651_v62 }
  0xe4   : > { %v459_v49 = vpop.f32.mrf.mxu2 }
  0xe5   : > { %499 = vmatmul.f32.vlgmr.msrb.gmra.mxu3 %v459_v49  ;;  %v380_v50 = vpop.f32.mrf.mxu0  ;;  %v471_v56 = vpop.f32.mrf.mxu3  ;;  %665 = vmatpush.msra.mxu1 %v650_v0 }
  0xe6   : > { %420 = vmatmul.f32.gmra.mxu1 %v380_v50 }
  0xe7   : > { %666 = vmatpush.msra.mxu1 %v649_v2 }
  0xe8   : > { %1232 = vmatmul.msk.f32.gmra.mxu0 %vm335_vm0, %v1805_v17 }
  0xe9   : > { %667 = vmatpush.msra.mxu1 %v648_v24 }
  0xeb   : > { %668 = vmatpush.msra.mxu1 %v647_v4 }
  0xec   : > { %v462_v51 = vpop.f32.mrf.mxu2 }
  0xed   : > { %502 = vmatmul.f32.gmra.mxu3 %v462_v51  ;;  %v383_v52 = vpop.f32.mrf.mxu0  ;;  %v474_v22 = vpop.f32.mrf.mxu3  ;;  %669 = vmatpush.msra.mxu1 %v646_v6 }
  0xee   : > { %423 = vmatmul.f32.gmra.mxu1 %v383_v52 }
  0xf0   : > { %1233 = vmatmul.msk.f32.gmra.mxu0 %vm335_vm0, %v1816_v19 }
  0xf4   : > { %v465_v53 = vpop.f32.mrf.mxu2 }
  0xf5   : > { %505 = vmatmul.f32.gmra.mxu3 %v465_v53  ;;  %v386_v54 = vpop.f32.mrf.mxu0  ;;  %v477_v28 = vpop.f32.mrf.mxu3 }
  0xf6   : > { %426 = vmatmul.f32.gmra.mxu1 %v386_v54 }
  0xf8   : > { %1234 = vmatmul.msk.f32.gmra.mxu0 %vm335_vm0, %v1826_v21 }
  0xfc   : > { %v468_v55 = vpop.f32.mrf.mxu2 }
  0xfd   : > { %508 = vmatmul.f32.gmra.mxu3 %v468_v55  ;;  %v389_v57 = vpop.f32.mrf.mxu0  ;;  %v480_v10 = vpop.f32.mrf.mxu3 }
  0xfe   : > { %429 = vmatmul.f32.gmra.mxu1 %v389_v57 }
 0x100   : > { %1235 = vmatmul.msk.f32.gmra.mxu0 %vm335_vm0, %v1856_v27 }
 0x105   : > { %511 = vmatmul.f32.gmra.mxu3 %v471_v56  ;;  %v392_v63 = vpop.f32.mrf.mxu0 }
 0x106   : > { %432 = vmatmul.f32.gmra.mxu1 %v392_v63 }
 0x10d   : > { %514 = vmatmul.f32.gmra.mxu3 %v474_v22  ;;  %v395_v23 = vpop.f32.mrf.mxu0 }
 0x10e   : > { %435 = vmatmul.f32.gmra.mxu1 %v395_v23 }
 0x115   : > { %517 = vmatmul.f32.gmra.mxu3 %v477_v28  ;;  %v398_v9 = vpop.f32.mrf.mxu0 }
 0x116   : > { %438 = vmatmul.f32.gmra.mxu1 %v398_v9 }
 0x11d   : > { %520 = vmatmul.f32.gmra.mxu3 %v480_v10  ;;  %v573_v11 = vpop.f32.mrf.mxu0 }
 0x11e   : > { %1217 = vmatmul.msk.f32.vlgmr.msrb.gmra.mxu1 %vm335_vm0, %v1816_v19  ;;  %613 = vmatmul.f32.vlgmr.msrb.gmra.mxu2 %v573_v11 }
 0x125   : > { %v576_v12 = vpop.f32.mrf.mxu0 }
 0x126   : > { %1218 = vmatmul.msk.f32.gmra.mxu1 %vm335_vm0, %v1826_v21  ;;  %616 = vmatmul.f32.gmra.mxu2 %v576_v12 }
 0x12d   : > { %v579_v13 = vpop.f32.mrf.mxu0 }
 0x12e   : > { %1219 = vmatmul.msk.f32.gmra.mxu1 %vm335_vm0, %v1856_v27  ;;  %619 = vmatmul.f32.gmra.mxu2 %v579_v13 }
 0x135   : > { %v582_v14 = vpop.f32.mrf.mxu0 }
 0x136   : > { %622 = vmatmul.f32.gmra.mxu2 %v582_v14  ;;  %1220 = vmatmul.msk.f32.vlgmr.msra.gmra.mxu1 %vm335_vm0, %v1800_v16 }
 0x13d   : > { %v585_v15 = vpop.f32.mrf.mxu0 }
 0x13e   : > { %625 = vmatmul.f32.gmra.mxu2 %v585_v15  ;;  %1221 = vmatmul.msk.f32.gmra.mxu1 %vm335_vm0, %v1814_v18 }
 0x145   : > { %v769_v3 = vpop.f32.mrf.mxu0 }
 0x146   : > { %1222 = vmatmul.msk.f32.gmra.mxu1 %vm335_vm0, %v1824_v20 }
 0x14d   : > { %v772_v4 = vpop.f32.mrf.mxu0 }
 0x14e   : > { %1223 = vmatmul.msk.f32.gmra.mxu1 %vm335_vm0, %v1852_v26 }
 0x155   : > { %v775_v7 = vpop.f32.mrf.mxu0 }
 0x156   : > { %1224 = vmatmul.msk.f32.gmra.mxu1 %vm335_vm0, %v1805_v17 }
 0x15b   : > { %v418_v16 = vpop.f32.mrf.mxu1 }
 0x15c   : > { %v2041_v29 = vmul.f32 %v418_v16, %v418_v16 }
 0x15d   : > { %v778_v12 = vpop.f32.mrf.mxu0 }
 0x15e   : > { %1225 = vmatmul.msk.f32.gmra.mxu1 %vm335_vm0, %v1816_v19 }
 0x163   : > { %v421_v18 = vpop.f32.mrf.mxu1 }
 0x164   : > { %v2053_v32 = vmul.f32 %v421_v18, %v421_v18 }
 0x166   : > { %1226 = vmatmul.msk.f32.gmra.mxu1 %vm335_vm0, %v1826_v21 }
 0x168   : > { %v500_v20 = vpop.f32.mrf.mxu3 }
 0x169   : > { %v2043_v30 = vmul.f32 %v500_v20, %v500_v20  ;;  %v2045_v26 = vmul.f32 %v500_v20, %v418_v16  ;;  %v781_v16 = vpop.f32.mrf.mxu0 }
 0x16b   : > { %v2049_v31 = vadd.f32 %v2043_v30, %v2041_v29  ;;  %v424_v17 = vpop.f32.mrf.mxu1 }
 0x16c   : > { %v2063_v37 = vmul.f32 %v424_v17, %v424_v17 }
 0x16e   : > { %1227 = vmatmul.msk.f32.gmra.mxu1 %vm335_vm0, %v1856_v27 }
 0x170   : > { %v503_v19 = vpop.f32.mrf.mxu3 }
 0x171   : > { %v2055_v33 = vmul.f32 %v503_v19, %v503_v19  ;;  %v2057_v21 = vmul.f32 %v503_v19, %v421_v18  ;;  %v784_v20 = vpop.f32.mrf.mxu0 }
 0x173   : > { %v2061_v34 = vadd.f32 %v2055_v33, %v2053_v32  ;;  %v427_v35 = vpop.f32.mrf.mxu1 }
 0x174   : > { %v2073_v42 = vmul.f32 %v427_v35, %v427_v35 }
 0x178   : > { %v506_v36 = vpop.f32.mrf.mxu3 }
 0x179   : > { %v2065_v38 = vmul.f32 %v506_v36, %v506_v36  ;;  %v2067_v39 = vmul.f32 %v506_v36, %v424_v17  ;;  %v787_v17 = vpop.f32.mrf.mxu0 }
 0x17b   : > { %v2071_v27 = vadd.f32 %v2065_v38, %v2063_v37  ;;  %v430_v40 = vpop.f32.mrf.mxu1 }
 0x17c   : > { %v2083_v48 = vmul.f32 %v430_v40, %v430_v40 }
 0x180   : > { %v509_v41 = vpop.f32.mrf.mxu3 }
 0x181   : > { %v2075_v43 = vmul.f32 %v509_v41, %v509_v41  ;;  %v2077_v44 = vmul.f32 %v509_v41, %v427_v35 }
 0x183   : > { %v2081_v45 = vadd.f32 %v2075_v43, %v2073_v42  ;;  %v433_v46 = vpop.f32.mrf.mxu1 }
 0x184   : > { %v2093_v54 = vmul.f32 %v433_v46, %v433_v46 }
 0x188   : > { %v512_v47 = vpop.f32.mrf.mxu3 }
 0x189   : > { %v2085_v49 = vmul.f32 %v512_v47, %v512_v47  ;;  %v2087_v50 = vmul.f32 %v512_v47, %v430_v40 }
 0x18b   : > { %v2091_v51 = vadd.f32 %v2085_v49, %v2083_v48  ;;  %v436_v52 = vpop.f32.mrf.mxu1 }
 0x18c   : > { %v2105_v60 = vmul.f32 %v436_v52, %v436_v52 }
 0x190   : > { %v515_v53 = vpop.f32.mrf.mxu3 }
 0x191   : > { %v2095_v55 = vmul.f32 %v515_v53, %v515_v53  ;;  %v2097_v56 = vmul.f32 %v515_v53, %v433_v46 }
 0x193   : > { %v2101_v57 = vadd.f32 %v2095_v55, %v2093_v54  ;;  %v2103_v58 = vpop.f32.mrf.mxu1 }
 0x198   : > { %v518_v59 = vpop.f32.mrf.mxu3 }
 0x199   : > { %v2107_v61 = vmul.f32 %v518_v59, %v518_v59  ;;  %v2109_v62 = vmul.f32 %v518_v59, %v436_v52 }
 0x19b   : > { %v2113_v63 = vadd.f32 %v2107_v61, %v2105_v60  ;;  %v588_v22 = vpop.f32.mrf.mxu1 }
 0x19c   : > { %628 = vmatmul.f32.gmra.mxu2 %v588_v22  ;;  %v890_v22 = vadd.f32 0.0001, %v2049_v31 }
 0x1a0   : > { %v2133_v41 = vpop.f32.mrf.mxu3 }
 0x1a1   : > { %v614_v0 = vpop.f32.mrf.mxu2 }
 0x1a2   : > { %v638_v1 = vsub.f32 %v614_v0, %v2041_v29 }
 0x1a3   : > { %v591_v2 = vpop.f32.mrf.mxu1 }
 0x1a4   : > { %631 = vmatmul.f32.gmra.mxu2 %v591_v2 }
 0x1a9   : > { %v617_v23 = vpop.f32.mrf.mxu2 }
 0x1aa   : > { %v639_v24 = vsub.f32 %v617_v23, %v2053_v32  ;;  %v790_v32 = vpop.f32.mrf.mxu0 }
 0x1ab   : > { %v594_v25 = vpop.f32.mrf.mxu1 }
 0x1ac   : > { %634 = vmatmul.f32.gmra.mxu2 %v594_v25 }
 0x1b1   : > { %v2117_v5 = vpop.f32.mrf.mxu2 }
 0x1b2   : > { %v640_v28 = vsub.f32 %v2117_v5, %v2063_v37 }
 0x1b3   : > { %v671_v6 = vpop.f32.mrf.mxu1 }
 0x1b4   : > { %711 = vmatmul.f32.vlgmr.msra.gmra.mxu3 %v671_v6  ;;  %809 = vmatmul.f32.vlgmr.msra.gmra.mxu2 %v769_v3 }
 0x1b9   : > { %v2121_v8 = vpop.f32.mrf.mxu2 }
 0x1ba   : > { %v641_v9 = vsub.f32 %v2121_v8, %v2073_v42 }
 0x1bb   : > { %v674_v10 = vpop.f32.mrf.mxu1 }
 0x1bc   : > { %714 = vmatmul.f32.gmra.mxu3 %v674_v10  ;;  %812 = vmatmul.f32.gmra.mxu2 %v772_v4 }
 0x1c1   : > { %v2125_v11 = vpop.f32.mrf.mxu2 }
 0x1c2   : > { %v642_v13 = vsub.f32 %v2125_v11, %v2083_v48 }
 0x1c3   : > { %v677_v14 = vpop.f32.mrf.mxu1 }
 0x1c4   : > { %717 = vmatmul.f32.gmra.mxu3 %v677_v14  ;;  %815 = vmatmul.f32.gmra.mxu2 %v775_v7  ;;  %v891_v7 = vadd.f32 0.0001, %v2061_v34 }
 0x1cb   : > { %v680_v15 = vpop.f32.mrf.mxu1 }
 0x1cc   : > { %720 = vmatmul.f32.gmra.mxu3 %v680_v15  ;;  %818 = vmatmul.f32.gmra.mxu2 %v778_v12 }
 0x1d3   : > { %v683_v18 = vpop.f32.mrf.mxu1 }
 0x1d4   : > { %723 = vmatmul.f32.gmra.mxu3 %v683_v18  ;;  %821 = vmatmul.f32.gmra.mxu2 %v781_v16  ;;  %v842_v18 = vmul.f32 2.0, %v2045_v26 }
 0x1db   : > { %v686_v29 = vpop.f32.mrf.mxu1 }
 0x1dc   : > { %726 = vmatmul.f32.gmra.mxu3 %v686_v29  ;;  %824 = vmatmul.f32.gmra.mxu2 %v784_v20 }
 0x1e3   : > { %v689_v19 = vpop.f32.mrf.mxu1 }
 0x1e4   : > { %729 = vmatmul.f32.gmra.mxu3 %v689_v19  ;;  %827 = vmatmul.f32.gmra.mxu2 %v787_v17 }
 0x1eb   : > { %v692_v35 = vpop.f32.mrf.mxu1 }
 0x1ec   : > { %732 = vmatmul.f32.gmra.mxu3 %v692_v35  ;;  %830 = vmatmul.f32.gmra.mxu2 %v790_v32  ;;  %v892_v32 = vadd.f32 0.0001, %v2071_v27 }
 0x21f   : > { %v2129_v36 = vpop.f32.mrf.mxu2 }
 0x220   : > { %v643_v48 = vsub.f32 %v2129_v36, %v2093_v54 }
 0x227   : > { %v2131_v40 = vpop.f32.mrf.mxu2 }
 0x22f   : > { %v2135_v46 = vpop.f32.mrf.mxu2 }
 0x237   : > { %v712_v47 = vpop.f32.mrf.mxu3  ;;  %v810_v52 = vpop.f32.mrf.mxu2 }
 0x238   : > { %v736_v53 = vsub.f32 %v712_v47, %v2043_v30  ;;  %v834_v4 = vsub.f32 %v810_v52, %v2045_v26  ;;  %v850_v47 = vadd.f32 0.0001, %v842_v18 }
 0x23a   : > { %v898_v59 = vadd.f32 %v736_v53, %v638_v1  ;;  %v858_v14 = vmul.f32 2.0, %v834_v4 }
 0x23c   : > { %v906_v0 = vadd.f32 0.0009, %v898_v59  ;;  %v866_v29 = vadd.f32 0.0009, %v858_v14 }
 0x23e   : > { %v914_v2 = vmul.f32 %v906_v0, %v890_v22  ;;  %v874_v59 = vmul.f32 %v866_v29, %v850_v47 }
 0x23f   : > { %v715_v3 = vpop.f32.mrf.mxu3  ;;  %v813_v23 = vpop.f32.mrf.mxu2 }
 0x240   : > { %1332 = vrcp.f32 %v914_v2  ;;  %v737_v25 = vsub.f32 %v715_v3, %v2055_v33  ;;  %v933_v33 = vand.u32 2147483648, %v914_v2  ;;  %v931_v17 = vand.u32 2147483647, %v914_v2 }
 0x241   : > { %v835_v19 = vsub.f32 %v813_v23, %v2057_v21  ;;  %vm927_vm2 = vweird.f32 %v914_v2  ;;  %v843_v23 = vmul.f32 2.0, %v2057_v21 }
 0x242   : > { %v899_v6 = vadd.f32 %v737_v25, %v639_v24  ;;  %v934_v26 = vor.u32 1.1754944e-38, %v933_v33  ;;  %vm932_vm4 = vcmp.eq.f32.partialorder %v931_v17, 8.507059e+37 }
 0x243   : > { %v859_v37 = vmul.f32 2.0, %v835_v19 }
 0x244   : > { %v907_v10 = vadd.f32 0.0009, %v899_v6 }
 0x245   : > { %v867_v6 = vadd.f32 0.0009, %v859_v37 }
 0x246   : > { %v1333_v12 = vpop.eup %1332  ;;  %v915_v30 = vmul.f32 %v907_v10, %v891_v7 }
 0x247   : > { %v923_v15 = vmul.f32 %v1333_v12, %v914_v2  ;;  %v718_v1 = vpop.f32.mrf.mxu3  ;;  %v816_v16 = vpop.f32.mrf.mxu2  ;;  %vm928_vm1 = vweird.f32 %v1333_v12 }
 0x248   : > { %v738_v31 = vsub.f32 %v718_v1, %v2065_v38  ;;  %1334 = vrcp.f32 %v915_v30  ;;  %vm929_vm3 = vmor %vm927_vm2, %vm928_vm1  ;;  %v836_v4 = vsub.f32 %v816_v16, %v2067_v39  ;;  %v947_v7 = vand.u32 2147483648, %v915_v30 }
 0x249   : > { %v924_v20 = vsub.f32 1.0, %v923_v15  ;;  %v851_v15 = vadd.f32 0.0001, %v843_v23  ;;  %v893_v1 = vadd.f32 0.0001, %v2081_v45  ;;  %vm941_vm6 = vweird.f32 %v915_v30 }
 0x24a   : > { %v900_v24 = vadd.f32 %v738_v31, %v640_v28  ;;  %v860_v18 = vmul.f32 2.0, %v836_v4  ;;  %v844_v16 = vmul.f32 2.0, %v2067_v39  ;;  %v948_v29 = vor.u32 1.1754944e-38, %v947_v7 }
 0x24b   : > { %v925_v34 = vmul.f32 %v1333_v12, %v924_v20  ;;  %v895_v7 = vadd.f32 0.0001, %v2101_v57  ;;  %v644_v57 = vsub.f32 %v2131_v40, %v2105_v60  ;;  %v539_v60 = vmul.f32 %v2133_v41, %v2133_v41 }
 0x24c   : > { %v908_v35 = vadd.f32 0.0009, %v900_v24  ;;  %v868_v19 = vadd.f32 0.0009, %v860_v18 }
 0x24d   : > { %v926_v38 = vadd.f32 %v1333_v12, %v925_v34 }
 0x24e   : > { %v916_v52 = vmul.f32 %v908_v35, %v892_v32  ;;  %v1335_v53 = vpop.eup %1334 }
 0x24f   : > { %v930_v22 = vsel %vm929_vm3, %v1333_v12, %v926_v38  ;;  %v721_v5 = vpop.f32.mrf.mxu3  ;;  %v937_v0 = vmul.f32 %v1335_v53, %v915_v30  ;;  %v819_v3 = vpop.f32.mrf.mxu2  ;;  %vm942_vm5 = vweird.f32 %v1335_v53  ;;  %v945_v12 = vand.u32 2147483647, %v915_v30 }
 0x250   : > { %v935_v28 = vsel %vm932_vm4, %v934_v26, %v930_v22  ;;  %1336 = vrcp.f32 %v916_v52  ;;  %v739_v2 = vsub.f32 %v721_v5, %v2075_v43  ;;  %v875_v43 = vmul.f32 %v867_v6, %v851_v15  ;;  %vm943_vm7 = vmor %vm941_vm6, %vm942_vm5 }
 0x251   : > { %v1034_v27 = vmul.f32 %v935_v28, %v874_v59  ;;  %v938_v25 = vsub.f32 1.0, %v937_v0  ;;  %vm946_vm8 = vcmp.eq.f32.partialorder %v945_v12, 8.507059e+37  ;;  %v961_v30 = vand.u32 2147483648, %v916_v52 }
 0x252   : > { %v901_v14 = vadd.f32 %v739_v2, %v641_v9  ;;  %v959_v35 = vand.u32 2147483647, %v916_v52  ;;  %v852_v38 = vadd.f32 0.0001, %v844_v16  ;;  %v894_v26 = vadd.f32 0.0001, %v2091_v51 }
 0x253   : > { %v939_v10 = vmul.f32 %v1335_v53, %v938_v25  ;;  %vm955_vm10 = vweird.f32 %v916_v52  ;;  %v837_v59 = vsub.f32 %v819_v3, %v2077_v44  ;;  %v962_v37 = vor.u32 1.1754944e-38, %v961_v30 }
 0x254   : > { %v909_v20 = vadd.f32 0.0009, %v901_v14  ;;  %v876_v5 = vmul.f32 %v868_v19, %v852_v38  ;;  %vm960_vm12 = vcmp.eq.f32.partialorder %v959_v35, 8.507059e+37 }
 0x255   : > { %v940_v21 = vadd.f32 %v1335_v53, %v939_v10  ;;  %v861_v3 = vmul.f32 2.0, %v837_v59 }
 0x256   : > { %v1337_v31 = vpop.eup %1336  ;;  %v2157_v17 = vmul.f32 %v909_v20, %v893_v1 }
 0x257   : > { %v951_v33 = vmul.f32 %v1337_v31, %v916_v52  ;;  %v724_v24 = vpop.f32.mrf.mxu3  ;;  %v944_v34 = vsel %vm943_vm7, %v1335_v53, %v940_v21  ;;  %v822_v32 = vpop.f32.mrf.mxu2  ;;  %vm956_vm9 = vweird.f32 %v1337_v31  ;;  %v846_v21 = vmul.f32 2.0, %v2087_v50 }
 0x258   : > { %v740_v42 = vsub.f32 %v724_v24, %v2085_v49  ;;  %v949_v8 = vsel %vm946_vm8, %v948_v29, %v944_v34  ;;  %1338 = vrcp.f32 %v2157_v17  ;;  %vm957_vm11 = vmor %vm955_vm10, %vm956_vm9  ;;  %v975_v10 = vand.u32 2147483648, %v2157_v17 }
 0x259   : > { %v952_v45 = vsub.f32 1.0, %v951_v33  ;;  %v1035_v9 = vmul.f32 %v949_v8, %v875_v43  ;;  %v838_v54 = vsub.f32 %v822_v32, %v2087_v50  ;;  %v973_v15 = vand.u32 2147483647, %v2157_v17 }
 0x25a   : > { %v902_v47 = vadd.f32 %v740_v42, %v642_v13  ;;  %vm969_vm14 = vweird.f32 %v2157_v17  ;;  %v976_v16 = vor.u32 1.1754944e-38, %v975_v10  ;;  %v531_v50 = vmul.f32 %v2103_v58, %v2103_v58 }
 0x25b   : > { %v953_v39 = vmul.f32 %v1337_v31, %v952_v45  ;;  %v1043_v53 = vadd.f32 %v1035_v9, %v1034_v27  ;;  %v845_v27 = vmul.f32 2.0, %v2077_v44  ;;  %v862_v29 = vmul.f32 2.0, %v838_v54 }
 0x25c   : > { %v910_v22 = vadd.f32 0.0009, %v902_v47  ;;  %vm974_vm0 = vcmp.eq.f32.partialorder %v973_v15, 8.507059e+37 }
 0x25d   : > { %v954_v49 = vadd.f32 %v1337_v31, %v953_v39  ;;  %v853_v1 = vadd.f32 0.0001, %v845_v27  ;;  %v870_v19 = vadd.f32 0.0009, %v862_v29  ;;  %v896_v39 = vadd.f32 0.0001, %v2113_v63 }
 0x25e   : > { %v2166_v0 = vmul.f32 %v910_v22, %v894_v26  ;;  %v1339_v25 = vpop.eup %1338  ;;  %v889_v26 = vadd.f32 %v539_v60, %v531_v50 }
 0x25f   : > { %v958_v28 = vsel %vm957_vm11, %v1337_v31, %v954_v49  ;;  %v727_v23 = vpop.f32.mrf.mxu3  ;;  %v965_v52 = vmul.f32 %v1339_v25, %v2157_v17  ;;  %v825_v12 = vpop.f32.mrf.mxu2  ;;  %vm970_vm13 = vweird.f32 %v1339_v25 }
 0x260   : > { %v963_v11 = vsel %vm960_vm12, %v962_v37, %v958_v28  ;;  %v741_v51 = vsub.f32 %v727_v23, %v2095_v55  ;;  %1340 = vrcp.f32 %v2166_v0  ;;  %v869_v55 = vadd.f32 0.0009, %v861_v3  ;;  %vm971_vm15 = vmor %vm969_vm14, %vm970_vm13 }
 0x261   : > { %v1036_v13 = vmul.f32 %v963_v11, %v876_v5  ;;  %v966_v6 = vsub.f32 1.0, %v965_v52  ;;  %v989_v8 = vand.u32 2147483648, %v2166_v0  ;;  %v839_v45 = vsub.f32 %v825_v12, %v2097_v56 }
 0x262   : > { %v903_v4 = vadd.f32 %v741_v51, %v643_v48  ;;  %v877_v33 = vmul.f32 %v869_v55, %v853_v1  ;;  %v987_v32 = vand.u32 2147483647, %v2166_v0  ;;  %vm983_vm2 = vweird.f32 %v2166_v0 }
 0x263   : > { %v1044_v2 = vadd.f32 %v1043_v53, %v1036_v13  ;;  %v967_v14 = vmul.f32 %v1339_v25, %v966_v6  ;;  %v645_v53 = vsub.f32 %v2135_v46, %v531_v50  ;;  %v990_v22 = vor.u32 1.1754944e-38, %v989_v8 }
 0x264   : > { %v911_v36 = vadd.f32 0.0009, %v903_v4  ;;  %v863_v5 = vmul.f32 2.0, %v839_v45  ;;  %vm988_vm4 = vcmp.eq.f32.partialorder %v987_v32, 8.507059e+37  ;;  %v847_v11 = vmul.f32 2.0, %v2097_v56 }
 0x265   : > { %v968_v18 = vadd.f32 %v1339_v25, %v967_v14 }
 0x266   : > { %v2178_v31 = vmul.f32 %v911_v36, %v895_v7  ;;  %v1341_v44 = vpop.eup %1340  ;;  %v871_v3 = vadd.f32 0.0009, %v863_v5  ;;  %v855_v54 = vadd.f32 0.0001, %v847_v11 }
 0x267   : > { %v730_v20 = vpop.f32.mrf.mxu3  ;;  %v979_v43 = vmul.f32 %v1341_v44, %v2166_v0  ;;  %v972_v24 = vsel %vm971_vm15, %v1339_v25, %v968_v18  ;;  %vm984_vm1 = vweird.f32 %v1341_v44  ;;  %v828_v59 = vpop.f32.mrf.mxu2  ;;  %v547_v18 = vmul.f32 %v2133_v41, %v2103_v58 }
 0x268   : > { %1342 = vrcp.f32 %v2178_v31  ;;  %v742_v34 = vsub.f32 %v730_v20, %v2107_v61  ;;  %v977_v40 = vsel %vm974_vm0, %v976_v16, %v972_v24  ;;  %v854_v61 = vadd.f32 0.0001, %v846_v21  ;;  %vm985_vm3 = vmor %vm983_vm2, %vm984_vm1 }
 0x269   : > { %v980_v17 = vsub.f32 1.0, %v979_v43  ;;  %v1037_v42 = vmul.f32 %v977_v40, %v877_v33  ;;  %v1003_v0 = vand.u32 2147483648, %v2178_v31  ;;  %v1001_v4 = vand.u32 2147483647, %v2178_v31 }
 0x26a   : > { %v904_v9 = vadd.f32 %v742_v34, %v644_v57  ;;  %v878_v25 = vmul.f32 %v870_v19, %v854_v61  ;;  %v840_v7 = vsub.f32 %v828_v59, %v2109_v62  ;;  %vm997_vm6 = vweird.f32 %v2178_v31 }
 0x26b   : > { %v981_v30 = vmul.f32 %v1341_v44, %v980_v17  ;;  %v1045_v35 = vadd.f32 %v1044_v2, %v1037_v42  ;;  %v897_v2 = vadd.f32 0.0001, %v889_v26  ;;  %v1004_v56 = vor.u32 1.1754944e-38, %v1003_v0 }
 0x26c   : > { %v912_v47 = vadd.f32 0.0009, %v904_v9  ;;  %v879_v14 = vmul.f32 %v871_v3, %v855_v54  ;;  %vm1002_vm8 = vcmp.eq.f32.partialorder %v1001_v4, 8.507059e+37  ;;  %v864_v21 = vmul.f32 2.0, %v840_v7 }
 0x26d   : > { %v982_v49 = vadd.f32 %v1341_v44, %v981_v30  ;;  %v848_v16 = vmul.f32 2.0, %v2109_v62  ;;  %v849_v45 = vmul.f32 2.0, %v547_v18 }
 0x26e   : > { %v1343_v38 = vpop.eup %1342  ;;  %v920_v28 = vmul.f32 %v912_v47, %v896_v39  ;;  %v872_v24 = vadd.f32 0.0009, %v864_v21 }
 0x26f   : > { %v993_v37 = vmul.f32 %v1343_v38, %v2178_v31  ;;  %v733_v23 = vpop.f32.mrf.mxu3  ;;  %v986_v48 = vsel %vm985_vm3, %v1341_v44, %v982_v49  ;;  %vm998_vm5 = vweird.f32 %v1343_v38  ;;  %v831_v57 = vpop.f32.mrf.mxu2  ;;  %v856_v40 = vadd.f32 0.0001, %v848_v16 }
 0x270   : > { %v743_v63 = vsub.f32 %v733_v23, %v539_v60  ;;  %v991_v51 = vsel %vm988_vm4, %v990_v22, %v986_v48  ;;  %1344 = vrcp.f32 %v920_v28  ;;  %vm999_vm7 = vmor %vm997_vm6, %vm998_vm5  ;;  %v1017_v29 = vand.u32 2147483648, %v920_v28 }
 0x271   : > { %v994_v13 = vsub.f32 1.0, %v993_v37  ;;  %v1038_v46 = vmul.f32 %v991_v51, %v878_v25  ;;  %v841_v33 = vsub.f32 %v831_v57, %v547_v18  ;;  %v1015_v50 = vand.u32 2147483647, %v920_v28 }
 0x272   : > { %v905_v52 = vadd.f32 %v743_v63, %v645_v53  ;;  %vm1011_vm10 = vweird.f32 %v920_v28  ;;  %v1018_v42 = vor.u32 1.1754944e-38, %v1017_v29  ;;  %v880_v8 = vmul.f32 %v872_v24, %v856_v40 }
 0x273   : > { %v995_v27 = vmul.f32 %v1343_v38, %v994_v13  ;;  %v1046_v6 = vadd.f32 %v1045_v35, %v1038_v46  ;;  %v865_v41 = vmul.f32 2.0, %v841_v33  ;;  %vm1016_vm12 = vcmp.eq.f32.partialorder %v1015_v50, 8.507059e+37 }
 0x274   : > { %v913_v10 = vadd.f32 0.0009, %v905_v52 }
 0x275   : > { %v996_v36 = vadd.f32 %v1343_v38, %v995_v27  ;;  %v873_v61 = vadd.f32 0.0009, %v865_v41 }
 0x276   : > { %v921_v12 = vmul.f32 %v913_v10, %v897_v2  ;;  %v1345_v55 = vpop.eup %1344 }
 0x277   : > { %v1000_v15 = vsel %vm999_vm7, %v1343_v38, %v996_v36  ;;  %v1007_v44 = vmul.f32 %v1345_v55, %v920_v28  ;;  %vm1012_vm9 = vweird.f32 %v1345_v55  ;;  %v857_v38 = vadd.f32 0.0001, %v849_v45 }
 0x278   : > { %v1005_v1 = vsel %vm1002_vm8, %v1004_v56, %v1000_v15  ;;  %1346 = vrcp.f32 %v921_v12  ;;  %vm1013_vm11 = vmor %vm1011_vm10, %vm1012_vm9  ;;  %v1031_v32 = vand.u32 2147483648, %v921_v12  ;;  %v1029_v35 = vand.u32 2147483647, %v921_v12 }
 0x279   : > { %v1039_v20 = vmul.f32 %v1005_v1, %v879_v14  ;;  %v1008_v43 = vsub.f32 1.0, %v1007_v44  ;;  %vm1025_vm14 = vweird.f32 %v921_v12  ;;  %v881_v49 = vmul.f32 %v873_v61, %v857_v38 }
 0x27a   : > { %v1032_v53 = vor.u32 1.1754944e-38, %v1031_v32  ;;  %vm1030_vm0 = vcmp.eq.f32.partialorder %v1029_v35, 8.507059e+37 }
 0x27b   : > { %v1047_v31 = vadd.f32 %v1046_v6, %v1039_v20  ;;  %v1009_v34 = vmul.f32 %v1345_v55, %v1008_v43 }
 0x27d   : > { %v1010_v17 = vadd.f32 %v1345_v55, %v1009_v34 }
 0x27e   : > { %v1347_v60 = vpop.eup %1346 }
 0x27f   : > { %v1021_v58 = vmul.f32 %v1347_v60, %v921_v12  ;;  %v1014_v62 = vsel %vm1013_vm11, %v1345_v55, %v1010_v17  ;;  %vm1026_vm13 = vweird.f32 %v1347_v60 }
 0x280   : > { %v1019_v9 = vsel %vm1016_vm12, %v1018_v42, %v1014_v62  ;;  %vm1027_vm15 = vmor %vm1025_vm14, %vm1026_vm13 }
 0x281   : > { %v1022_v19 = vsub.f32 1.0, %v1021_v58  ;;  %v1040_v30 = vmul.f32 %v1019_v9, %v880_v8 }
 0x283   : > { %v1023_v39 = vmul.f32 %v1347_v60, %v1022_v19  ;;  %v1048_v47 = vadd.f32 %v1047_v31, %v1040_v30 }
 0x285   : > { %v1024_v26 = vadd.f32 %v1347_v60, %v1023_v39 }
 0x287   : > { %v1028_v59 = vsel %vm1027_vm15, %v1347_v60, %v1024_v26 }
 0x288   : > { %v1033_v22 = vsel %vm1030_vm0, %v1032_v53, %v1028_v59 }
 0x289   : > { %v1041_v37 = vmul.f32 %v1033_v22, %v881_v49 }
 0x28b   : > { %v1049_v5 = vadd.f32 %v1048_v47, %v1041_v37 }
 0x28d   : > { %1050 = vst [vmem:[%s292_s19] sm:$0xff] %v1049_v5 }
 0x28e   : > { %1495 = shalt.err (!%p1492_p11)
}
 0x28f   : > { %1270 = dma.vmem_to_hbm [thread:$0]  (%p1649_p3), %s1065_s27, 128, %s1067_s28, %s1052_s9  }
 0x290 PF: > { %s1078_s23 = sand.u32 1, %s1534_s15   ;;  %p2262_p12 = scmp.ge.s32.totalorder %s1546_s18, 2 }
 0x291   : > { %s1079_s30 = scalar_lea.sflag [#allocation4], %s1078_s23 }
 0x292   : > { %p1287_p13 = pnand %p2262_p12, %p1612_p6 }
 0x294   : > { %p1288_p0 = pneg %p1287_p13 }
 0x296   : > { %1529 = dma.done.wait (%p1288_p0), %s1079_s30, 128  }
 0x297   : > { %1531 = vsyncadd (%p1288_p0), %s1079_s30, 4294967168  ;;  %p21_p5 = scmp.ge.s32.totalorder %s1639_s10, 4   ;;  %s2263_s15 = smov %s1538_s16 }
 0x298   : > { %s2264_s16 = smov %s1542_s17  ;;  %s2265_s17 = smov %s1655_s14 }
 0x299   : > { %s2266_s18 = smov %s1639_s10  ;;  %23 = sbr.rel (!%p21_p5) target bundleno = 12 (0xc), region = 102 }
 0x29e   :  { %1085 = vsyncpa [#allocation3], 1 }
 0x29f   :  { %1087 = vsyncpa [#allocation3 + $0x1], 1 }
 0x2a0   :  { %1088 = vsyncpa [#allocation6], 1 }
 0x2a1   :  { %1090 = vsyncpa [#allocation6 + $0x1], 1 }
 0x2a2   :  { %1091 = vsyncpa [#allocation9], 1 }
 0x2a3   :  { %1092 = vsyncpa [#allocation4], 1 }
 0x2a4   :  { %1094 = vsyncpa [#allocation4 + $0x1], 1 }

</bundles_post_ra>
